<compile_context>
chip_gen: v7x
topology: tpu7x:2x2x1
jax: 0.10.0
libtpu: 0.0.40
codegen_flags: <defaults>
</compile_context>

<pallas_src>
import functools

import jax
import jax.numpy as jnp
from jax.experimental import pallas as pl
from jax.experimental.pallas import tpu as pltpu

_MiB = 1024 * 1024


def _round_up(a, m):
    return -(-a // m) * m


def _device_kind():
    try:
        return jax.devices()[0].device_kind.lower()
    except Exception:
        return ""


def _mlp_kernel(x_ref, w1_ref, b1_ref, w2_ref, b2_ref, w3_ref, b3_ref, o_ref,
                *, bf16_elementwise):
    # x_ref:  (TB, D) f32/bf16   w1_ref: (D, H) bf16   b1_ref: (1, H) f32
    # w2_ref: (H, H)  bf16       b2_ref: (1, H) f32
    # w3_ref: (1, H)  f32        b3_ref: (1, 1) f32
    # o_ref:  (TB, 1) f32
    x = x_ref[...].astype(jnp.bfloat16)            # in-kernel cast (free under MXU/DMA)
    h1 = jnp.dot(x, w1_ref[...], preferred_element_type=jnp.float32)
    if bf16_elementwise:                           # v6e/v7x: bf16 VPU path
        h1 = jnp.maximum(h1.astype(jnp.bfloat16) + b1_ref[...].astype(jnp.bfloat16), 0.0)
    else:                                          # v5e: f32 VPU, then pack to bf16
        h1 = jnp.maximum(h1 + b1_ref[...], 0.0).astype(jnp.bfloat16)
    h2 = jnp.dot(h1, w2_ref[...], preferred_element_type=jnp.float32)
    if bf16_elementwise:
        h2 = jnp.maximum(h2.astype(jnp.bfloat16) + b2_ref[...].astype(jnp.bfloat16),
                         0.0).astype(jnp.float32)
    else:
        h2 = jnp.maximum(h2 + b2_ref[...], 0.0)
    # Final Linear(H -> 1) on VPU + XLU (multiply + lane reduce), f32.
    out = jnp.sum(h2 * w3_ref[...], axis=-1, keepdims=True) + b3_ref[...]
    o_ref[...] = out.astype(o_ref.dtype)


def _vmem_needed(block_b, D, H, single_buffer_weights):
    wbuf = 1 if single_buffer_weights else 2
    x_bytes = 2 * block_b * D * 4                       # f32 x tile, double-buffered
    out_bytes = 2 * block_b * 4                         # (block_b, 1) f32, double-buffered
    w_bytes = wbuf * ((D * H + H * H) * 2 + (2 * H + H + 1) * 4)
    inter = 2 * block_b * H * 4                         # h1/h2 live intermediates (worst case f32)
    return x_bytes + out_bytes + w_bytes + inter


def _pick_block_b(B, D, H, vmem_cap):
    if B <= 128:
        return B                                        # single fat tile (block == full dim)
    if B <= 256:
        return _round_up(-(-B // 2), 8)                 # 2 grid steps -> both v7x TCs busy
    bb = 512
    while bb > 128 and _vmem_needed(bb, D, H, True) > vmem_cap:
        bb //= 2
    return bb


def _weight_spec(shape, single_buffer):
    idx = lambda i: (0,) * len(shape)
    if single_buffer and hasattr(pl, "Buffered"):
        try:
            return pl.BlockSpec(shape, idx, pipeline_mode=pl.Buffered(1))
        except TypeError:
            pass
    return pl.BlockSpec(shape, idx)


def _run(x2d, params, block_b, bf16_elementwise, vmem_limit, single_buffer_weights):
    w1, b1, w2, b2, w3t, b3 = params
    B, D = x2d.shape
    H = w1.shape[1]
    grid = (pl.cdiv(B, block_b),)
    kernel = functools.partial(_mlp_kernel, bf16_elementwise=bf16_elementwise)
    return pl.pallas_call(
        kernel,
        out_shape=jax.ShapeDtypeStruct((B, 1), jnp.float32),
        grid_spec=pltpu.PrefetchScalarGridSpec(
            num_scalar_prefetch=0,
            grid=grid,
            in_specs=[
                pl.BlockSpec((block_b, D), lambda i: (i, 0)),      # x tile (orig dtype)
                _weight_spec((D, H), single_buffer_weights),        # W1 bf16, resident
                _weight_spec((1, H), single_buffer_weights),        # b1 f32
                _weight_spec((H, H), single_buffer_weights),        # W2 bf16, resident
                _weight_spec((1, H), single_buffer_weights),        # b2 f32
                _weight_spec((1, H), single_buffer_weights),        # W3^T f32 (VPU operand)
                _weight_spec((1, 1), single_buffer_weights),        # b3 f32
            ],
            out_specs=pl.BlockSpec((block_b, 1), lambda i: (i, 0)),
        ),
        compiler_params=pltpu.CompilerParams(
            dimension_semantics=("parallel",),
            vmem_limit_bytes=vmem_limit,
        ),
    )(x2d, w1, b1, w2, b2, w3t, b3)


def reward_learner_forward(x, params):
    """x: [B, C, H, W] (or already [B, D]); returns [B, 1] float32."""
    w1 = params[0]
    B = x.shape[0]
    x2d = x.reshape(B, -1)                      # nn.Flatten; NO dtype cast here
    D = x2d.shape[1]
    H = w1.shape[1]

    kind = _device_kind()
    bf16_elementwise = ("v6" in kind) or ("v7" in kind)
    vmem_cap = (48 * _MiB) if ("v7" in kind) else (96 * _MiB)

    block_b = _pick_block_b(B, D, H, vmem_cap)
    vmem_limit = int(min(vmem_cap,
                         max(32 * _MiB, _vmem_needed(block_b, D, H, True) + 4 * _MiB)))

    try:
        out = _run(x2d, params, block_b, bf16_elementwise, vmem_limit,
                   single_buffer_weights=True)
    except Exception:
        # Fallback if pipeline_mode=pl.Buffered(1) is unsupported on this build.
        out = _run(x2d, params, block_b, bf16_elementwise, vmem_limit,
                   single_buffer_weights=False)
    return out


def init_params(key, input_dim, hidden_dim):
    """Deterministic synthetic init.
    MXU weights (W1, W2) stored as [in, out] in bf16; W3 stored transposed as
    (1, hidden) f32 (VPU operand); biases f32."""
    k1, k2, k3, k4, k5, k6 = jax.random.split(key, 6)
    s1 = 1.0 / jnp.sqrt(input_dim)
    s2 = 1.0 / jnp.sqrt(hidden_dim)
    w1 = jax.random.uniform(k1, (input_dim, hidden_dim), jnp.float32, -s1, s1)
    b1 = jax.random.uniform(k2, (1, hidden_dim), jnp.float32, -s1, s1)
    w2 = jax.random.uniform(k3, (hidden_dim, hidden_dim), jnp.float32, -s2, s2)
    b2 = jax.random.uniform(k4, (1, hidden_dim), jnp.float32, -s2, s2)
    w3t = jax.random.uniform(k5, (1, hidden_dim), jnp.float32, -s2, s2)
    b3 = jax.random.uniform(k6, (1, 1), jnp.float32, -s2, s2)
    return (w1.astype(jnp.bfloat16), b1, w2.astype(jnp.bfloat16), b2, w3t, b3)


def reference_forward(x, params, bf16_elementwise):
    """f32 reference that mirrors the kernel's bf16 operand rounding."""
    w1, b1, w2, b2, w3t, b3 = params
    f32 = jnp.float32
    bf16 = jnp.bfloat16
    x2d = x.reshape(x.shape[0], -1).astype(bf16).astype(f32)
    h1 = x2d @ w1.astype(f32)
    if bf16_elementwise:
        h1 = jnp.maximum(h1.astype(bf16) + b1.astype(bf16), 0.0).astype(f32)
    else:
        h1 = jnp.maximum(h1 + b1, 0.0).astype(bf16).astype(f32)
    h2 = h1 @ w2.astype(f32)
    if bf16_elementwise:
        h2 = jnp.maximum(h2.astype(bf16) + b2.astype(bf16), 0.0).astype(f32)
    else:
        h2 = jnp.maximum(h2 + b2, 0.0)
    return jnp.sum(h2 * w3t, axis=-1, keepdims=True) + b3


if __name__ == "__main__":
    # Small shapes: batch=16, channels=4, spatial=8x8 -> input_dim = 4*8*8 = 256
    B, C, Himg, Wimg = 16, 4, 8, 8
    input_dim = C * Himg * Wimg          # 256
    hidden_dim = 256

    key = jax.random.PRNGKey(0)
    kx, kp = jax.random.split(key)
    x = jax.random.normal(kx, (B, C, Himg, Wimg), jnp.float32)
    params = init_params(kp, input_dim, hidden_dim)

    out = reward_learner_forward(x, params)
    out = jax.block_until_ready(out)

    kind = _device_kind()
    ref = reference_forward(x, params, ("v6" in kind) or ("v7" in kind))
    assert out.shape == (B, 1), out.shape
    assert jnp.allclose(out, ref, atol=1e-2, rtol=5e-2), (
        float(jnp.max(jnp.abs(out - ref))))
    print("KERNEL_OK")
</pallas_src>

<mosaic_0001>
module attributes {stable_mosaic.version = 11 : i64} {
  func.func @_mlp_kernel(%arg0: i32, %arg1: memref<16x256xf32, #tpu.memory_space<vmem>>, %arg2: memref<256x256xbf16, #tpu.memory_space<vmem>>, %arg3: memref<1x256xf32, #tpu.memory_space<vmem>>, %arg4: memref<256x256xbf16, #tpu.memory_space<vmem>>, %arg5: memref<1x256xf32, #tpu.memory_space<vmem>>, %arg6: memref<1x256xf32, #tpu.memory_space<vmem>>, %arg7: memref<1x1xf32, #tpu.memory_space<vmem>>, %arg8: memref<16x1xf32, #tpu.memory_space<vmem>>) attributes {dimension_semantics = [#tpu.dimension_semantics<parallel>], iteration_bounds = array<i64: 1>, scalar_prefetch = 0 : i64, scratch_operands = 0 : i64, tpu.core_type = #tpu.core_type<tc>, window_params = [{transform_indices = @transform_0, window_bounds = array<i64: 16, 256>}, {pipeline_mode = #tpu.pipeline_mode<synchronous>, transform_indices = @transform_1, window_bounds = array<i64: 256, 256>}, {pipeline_mode = #tpu.pipeline_mode<synchronous>, transform_indices = @transform_2, window_bounds = array<i64: 1, 256>}, {pipeline_mode = #tpu.pipeline_mode<synchronous>, transform_indices = @transform_3, window_bounds = array<i64: 256, 256>}, {pipeline_mode = #tpu.pipeline_mode<synchronous>, transform_indices = @transform_4, window_bounds = array<i64: 1, 256>}, {pipeline_mode = #tpu.pipeline_mode<synchronous>, transform_indices = @transform_5, window_bounds = array<i64: 1, 256>}, {pipeline_mode = #tpu.pipeline_mode<synchronous>, transform_indices = @transform_6, window_bounds = array<i64: 1, 1>}, {transform_indices = @transform_7, window_bounds = array<i64: 16, 1>}]} {
    %c0 = arith.constant 0 : index
    %c0_0 = arith.constant 0 : index
    %0 = vector.load %arg1[%c0, %c0_0] : memref<16x256xf32, #tpu.memory_space<vmem>>, vector<16x256xf32>
    %1 = arith.truncf %0 : vector<16x256xf32> to vector<16x256xbf16>
    %c0_1 = arith.constant 0 : index
    %c0_2 = arith.constant 0 : index
    %2 = vector.load %arg2[%c0_1, %c0_2] : memref<256x256xbf16, #tpu.memory_space<vmem>>, vector<256x256xbf16>
    %cst = arith.constant dense<0.000000e+00> : vector<16x256xf32>
    %3 = tpu.matmul %1, %2, %cst {dimension_numbers = #tpu.dot_dimension_numbers<[1], [0], [0], [1], [0, 0, 1, 1], [], []>} : vector<16x256xbf16>, vector<256x256xbf16>, vector<16x256xf32> -> vector<16x256xf32>
    %c0_3 = arith.constant 0 : index
    %c0_4 = arith.constant 0 : index
    %4 = vector.load %arg3[%c0_3, %c0_4] : memref<1x256xf32, #tpu.memory_space<vmem>>, vector<1x256xf32>
    %5 = vector.broadcast %4 : vector<1x256xf32> to vector<16x256xf32>
    %6 = arith.addf %3, %5 : vector<16x256xf32>
    %cst_5 = arith.constant 0.000000e+00 : f32
    %7 = vector.broadcast %cst_5 : f32 to vector<16x256xf32>
    %8 = arith.maximumf %6, %7 : vector<16x256xf32>
    %9 = arith.truncf %8 : vector<16x256xf32> to vector<16x256xbf16>
    %c0_6 = arith.constant 0 : index
    %c0_7 = arith.constant 0 : index
    %10 = vector.load %arg4[%c0_6, %c0_7] : memref<256x256xbf16, #tpu.memory_space<vmem>>, vector<256x256xbf16>
    %cst_8 = arith.constant dense<0.000000e+00> : vector<16x256xf32>
    %11 = tpu.matmul %9, %10, %cst_8 {dimension_numbers = #tpu.dot_dimension_numbers<[1], [0], [0], [1], [0, 0, 1, 1], [], []>} : vector<16x256xbf16>, vector<256x256xbf16>, vector<16x256xf32> -> vector<16x256xf32>
    %c0_9 = arith.constant 0 : index
    %c0_10 = arith.constant 0 : index
    %12 = vector.load %arg5[%c0_9, %c0_10] : memref<1x256xf32, #tpu.memory_space<vmem>>, vector<1x256xf32>
    %13 = vector.broadcast %12 : vector<1x256xf32> to vector<16x256xf32>
    %14 = arith.addf %11, %13 : vector<16x256xf32>
    %cst_11 = arith.constant 0.000000e+00 : f32
    %15 = vector.broadcast %cst_11 : f32 to vector<16x256xf32>
    %16 = arith.maximumf %14, %15 : vector<16x256xf32>
    %c0_12 = arith.constant 0 : index
    %c0_13 = arith.constant 0 : index
    %17 = vector.load %arg6[%c0_12, %c0_13] : memref<1x256xf32, #tpu.memory_space<vmem>>, vector<1x256xf32>
    %18 = vector.broadcast %17 : vector<1x256xf32> to vector<16x256xf32>
    %19 = arith.mulf %16, %18 : vector<16x256xf32>
    %cst_14 = arith.constant dense<0.000000e+00> : vector<16xf32>
    %20 = vector.multi_reduction <add>, %19, %cst_14 [1] : vector<16x256xf32> to vector<16xf32>
    %21 = vector.shape_cast %20 : vector<16xf32> to vector<16x1xf32>
    %c0_15 = arith.constant 0 : index
    %c0_16 = arith.constant 0 : index
    %22 = vector.load %arg7[%c0_15, %c0_16] : memref<1x1xf32, #tpu.memory_space<vmem>>, vector<1x1xf32>
    %23 = vector.broadcast %22 : vector<1x1xf32> to vector<16x1xf32>
    %24 = arith.addf %21, %23 : vector<16x1xf32>
    %c0_17 = arith.constant 0 : index
    %c0_18 = arith.constant 0 : index
    %25 = vector.load %arg8[%c0_17, %c0_18] : memref<16x1xf32, #tpu.memory_space<vmem>>, vector<16x1xf32>
    tpu.vector_store %arg8[%c0_17, %c0_18], %24 {strides = array<i32>} : memref<16x1xf32, #tpu.memory_space<vmem>>, vector<16x1xf32>,
    return
  }
  func.func @transform_0(%arg0: i32) -> (i32, i32) {
    %c0_i32 = arith.constant 0 : i32
    %c0_i32_0 = arith.constant 0 : i32
    return %arg0, %c0_i32 : i32, i32
  }
  func.func @transform_1(%arg0: i32) -> (i32, i32) {
    %c0_i32 = arith.constant 0 : i32
    %c0_i32_0 = arith.constant 0 : i32
    %c0_i32_1 = arith.constant 0 : i32
    return %c0_i32, %c0_i32_0 : i32, i32
  }
  func.func @transform_2(%arg0: i32) -> (i32, i32) {
    %c0_i32 = arith.constant 0 : i32
    %c0_i32_0 = arith.constant 0 : i32
    %c0_i32_1 = arith.constant 0 : i32
    return %c0_i32, %c0_i32_0 : i32, i32
  }
  func.func @transform_3(%arg0: i32) -> (i32, i32) {
    %c0_i32 = arith.constant 0 : i32
    %c0_i32_0 = arith.constant 0 : i32
    %c0_i32_1 = arith.constant 0 : i32
    return %c0_i32, %c0_i32_0 : i32, i32
  }
  func.func @transform_4(%arg0: i32) -> (i32, i32) {
    %c0_i32 = arith.constant 0 : i32
    %c0_i32_0 = arith.constant 0 : i32
    %c0_i32_1 = arith.constant 0 : i32
    return %c0_i32, %c0_i32_0 : i32, i32
  }
  func.func @transform_5(%arg0: i32) -> (i32, i32) {
    %c0_i32 = arith.constant 0 : i32
    %c0_i32_0 = arith.constant 0 : i32
    %c0_i32_1 = arith.constant 0 : i32
    return %c0_i32, %c0_i32_0 : i32, i32
  }
  func.func @transform_6(%arg0: i32) -> (i32, i32) {
    %c0_i32 = arith.constant 0 : i32
    %c0_i32_0 = arith.constant 0 : i32
    %c0_i32_1 = arith.constant 0 : i32
    return %c0_i32, %c0_i32_0 : i32, i32
  }
  func.func @transform_7(%arg0: i32) -> (i32, i32) {
    %c0_i32 = arith.constant 0 : i32
    %c0_i32_0 = arith.constant 0 : i32
    return %arg0, %c0_i32 : i32, i32
  }
}

module attributes {stable_mosaic.version = 11 : i64} {
  func.func @_mlp_kernel(%arg0: i32, %arg1: memref<16x256xf32, #tpu.memory_space<vmem>>, %arg2: memref<256x256xbf16, #tpu.memory_space<vmem>>, %arg3: memref<1x256xf32, #tpu.memory_space<vmem>>, %arg4: memref<256x256xbf16, #tpu.memory_space<vmem>>, %arg5: memref<1x256xf32, #tpu.memory_space<vmem>>, %arg6: memref<1x256xf32, #tpu.memory_space<vmem>>, %arg7: memref<1x1xf32, #tpu.memory_space<vmem>>, %arg8: memref<16x1xf32, #tpu.memory_space<vmem>>) attributes {dimension_semantics = [#tpu.dimension_semantics<parallel>], iteration_bounds = array<i64: 1>, scalar_prefetch = 0 : i64, scratch_operands = 0 : i64, tpu.core_type = #tpu.core_type<tc>, window_params = [{transform_indices = @transform_0, window_bounds = array<i64: 16, 256>}, {pipeline_mode = #tpu.pipeline_mode<synchronous>, transform_indices = @transform_1, window_bounds = array<i64: 256, 256>}, {pipeline_mode = #tpu.pipeline_mode<synchronous>, transform_indices = @transform_2, window_bounds = array<i64: 1, 256>}, {pipeline_mode = #tpu.pipeline_mode<synchronous>, transform_indices = @transform_3, window_bounds = array<i64: 256, 256>}, {pipeline_mode = #tpu.pipeline_mode<synchronous>, transform_indices = @transform_4, window_bounds = array<i64: 1, 256>}, {pipeline_mode = #tpu.pipeline_mode<synchronous>, transform_indices = @transform_5, window_bounds = array<i64: 1, 256>}, {pipeline_mode = #tpu.pipeline_mode<synchronous>, transform_indices = @transform_6, window_bounds = array<i64: 1, 1>}, {transform_indices = @transform_7, window_bounds = array<i64: 16, 1>}]} {
    %c0 = arith.constant 0 : index
    %c0_0 = arith.constant 0 : index
    %0 = vector.load %arg1[%c0, %c0_0] : memref<16x256xf32, #tpu.memory_space<vmem>>, vector<16x256xf32>
    %1 = arith.truncf %0 : vector<16x256xf32> to vector<16x256xbf16>
    %c0_1 = arith.constant 0 : index
    %c0_2 = arith.constant 0 : index
    %2 = vector.load %arg2[%c0_1, %c0_2] : memref<256x256xbf16, #tpu.memory_space<vmem>>, vector<256x256xbf16>
    %cst = arith.constant dense<0.000000e+00> : vector<16x256xf32>
    %3 = tpu.matmul %1, %2, %cst {dimension_numbers = #tpu.dot_dimension_numbers<[1], [0], [0], [1], [0, 0, 1, 1], [], []>} : vector<16x256xbf16>, vector<256x256xbf16>, vector<16x256xf32> -> vector<16x256xf32>
    %c0_3 = arith.constant 0 : index
    %c0_4 = arith.constant 0 : index
    %4 = vector.load %arg3[%c0_3, %c0_4] : memref<1x256xf32, #tpu.memory_space<vmem>>, vector<1x256xf32>
    %5 = vector.broadcast %4 : vector<1x256xf32> to vector<16x256xf32>
    %6 = arith.addf %3, %5 : vector<16x256xf32>
    %cst_5 = arith.constant 0.000000e+00 : f32
    %7 = vector.broadcast %cst_5 : f32 to vector<16x256xf32>
    %8 = arith.maximumf %6, %7 : vector<16x256xf32>
    %9 = arith.truncf %8 : vector<16x256xf32> to vector<16x256xbf16>
    %c0_6 = arith.constant 0 : index
    %c0_7 = arith.constant 0 : index
    %10 = vector.load %arg4[%c0_6, %c0_7] : memref<256x256xbf16, #tpu.memory_space<vmem>>, vector<256x256xbf16>
    %cst_8 = arith.constant dense<0.000000e+00> : vector<16x256xf32>
    %11 = tpu.matmul %9, %10, %cst_8 {dimension_numbers = #tpu.dot_dimension_numbers<[1], [0], [0], [1], [0, 0, 1, 1], [], []>} : vector<16x256xbf16>, vector<256x256xbf16>, vector<16x256xf32> -> vector<16x256xf32>
    %c0_9 = arith.constant 0 : index
    %c0_10 = arith.constant 0 : index
    %12 = vector.load %arg5[%c0_9, %c0_10] : memref<1x256xf32, #tpu.memory_space<vmem>>, vector<1x256xf32>
    %13 = vector.broadcast %12 : vector<1x256xf32> to vector<16x256xf32>
    %14 = arith.addf %11, %13 : vector<16x256xf32>
    %cst_11 = arith.constant 0.000000e+00 : f32
    %15 = vector.broadcast %cst_11 : f32 to vector<16x256xf32>
    %16 = arith.maximumf %14, %15 : vector<16x256xf32>
    %c0_12 = arith.constant 0 : index
    %c0_13 = arith.constant 0 : index
    %17 = vector.load %arg6[%c0_12, %c0_13] : memref<1x256xf32, #tpu.memory_space<vmem>>, vector<1x256xf32>
    %18 = vector.broadcast %17 : vector<1x256xf32> to vector<16x256xf32>
    %19 = arith.mulf %16, %18 : vector<16x256xf32>
    %cst_14 = arith.constant dense<0.000000e+00> : vector<16xf32>
    %20 = vector.multi_reduction <add>, %19, %cst_14 [1] : vector<16x256xf32> to vector<16xf32>
    %21 = vector.shape_cast %20 : vector<16xf32> to vector<16x1xf32>
    %c0_15 = arith.constant 0 : index
    %c0_16 = arith.constant 0 : index
    %22 = vector.load %arg7[%c0_15, %c0_16] : memref<1x1xf32, #tpu.memory_space<vmem>>, vector<1x1xf32>
    %23 = vector.broadcast %22 : vector<1x1xf32> to vector<16x1xf32>
    %24 = arith.addf %21, %23 : vector<16x1xf32>
    %c0_17 = arith.constant 0 : index
    %c0_18 = arith.constant 0 : index
    %25 = vector.load %arg8[%c0_17, %c0_18] : memref<16x1xf32, #tpu.memory_space<vmem>>, vector<16x1xf32>
    tpu.vector_store %arg8[%c0_17, %c0_18], %24 {strides = array<i32>} : memref<16x1xf32, #tpu.memory_space<vmem>>, vector<16x1xf32>,
    return
  }
  func.func @transform_0(%arg0: i32) -> (i32, i32) {
    %c0_i32 = arith.constant 0 : i32
    %c0_i32_0 = arith.constant 0 : i32
    return %arg0, %c0_i32 : i32, i32
  }
  func.func @transform_1(%arg0: i32) -> (i32, i32) {
    %c0_i32 = arith.constant 0 : i32
    %c0_i32_0 = arith.constant 0 : i32
    %c0_i32_1 = arith.constant 0 : i32
    return %c0_i32, %c0_i32_0 : i32, i32
  }
  func.func @transform_2(%arg0: i32) -> (i32, i32) {
    %c0_i32 = arith.constant 0 : i32
    %c0_i32_0 = arith.constant 0 : i32
    %c0_i32_1 = arith.constant 0 : i32
    return %c0_i32, %c0_i32_0 : i32, i32
  }
  func.func @transform_3(%arg0: i32) -> (i32, i32) {
    %c0_i32 = arith.constant 0 : i32
    %c0_i32_0 = arith.constant 0 : i32
    %c0_i32_1 = arith.constant 0 : i32
    return %c0_i32, %c0_i32_0 : i32, i32
  }
  func.func @transform_4(%arg0: i32) -> (i32, i32) {
    %c0_i32 = arith.constant 0 : i32
    %c0_i32_0 = arith.constant 0 : i32
    %c0_i32_1 = arith.constant 0 : i32
    return %c0_i32, %c0_i32_0 : i32, i32
  }
  func.func @transform_5(%arg0: i32) -> (i32, i32) {
    %c0_i32 = arith.constant 0 : i32
    %c0_i32_0 = arith.constant 0 : i32
    %c0_i32_1 = arith.constant 0 : i32
    return %c0_i32, %c0_i32_0 : i32, i32
  }
  func.func @transform_6(%arg0: i32) -> (i32, i32) {
    %c0_i32 = arith.constant 0 : i32
    %c0_i32_0 = arith.constant 0 : i32
    %c0_i32_1 = arith.constant 0 : i32
    return %c0_i32, %c0_i32_0 : i32, i32
  }
  func.func @transform_7(%arg0: i32) -> (i32, i32) {
    %c0_i32 = arith.constant 0 : i32
    %c0_i32_0 = arith.constant 0 : i32
    return %arg0, %c0_i32 : i32, i32
  }
}

</mosaic_0001>

<bundles_post_ra>
// kernel: tpu_custom_call.1
= control target key start
LH: loop header
LB: loop body
LE: loop exit
PB: predicated region body
PF: predicated region fallthrough
CT: control target
= control target key end

     0   :  { %s964_s0 = inlined_call_operand.hbm [shape: f32[16,256], index: 0, kind: input, shape index: {}]   ;;  %s965_s1 = inlined_call_operand.hbm [shape: bf16[256,256], index: 1, kind: input, shape index: {}]   ;;  %s966_s2 = inlined_call_operand.vmem [shape: f32[1,256], index: 2, kind: input, shape index: {}]   ;;  %s967_s3 = inlined_call_operand.hbm [shape: bf16[256,256], index: 3, kind: input, shape index: {}]   ;;  %s968_s4 = inlined_call_operand.vmem [shape: f32[1,256], index: 4, kind: input, shape index: {}]   ;;  %s969_s5 = inlined_call_operand.vmem [shape: f32[1,256], index: 5, kind: input, shape index: {}]   ;;  %s970_s6 = inlined_call_operand.<no memory space> [shape: f32[1,1], index: 6, kind: input, shape index: {}]   ;;  %s971_s7 = inlined_call_operand.vmem [shape: f32[16,1], index: 7, kind: output, shape index: {}]  }
   0x1   :  { %v12_v0 = vstv %s970_s6 }
   0x2   :  { %13 = vst [vmem:[#allocation2] sm:$0x1] %v12_v0 }
   0x3   :  { %14 = vsyncpa [#allocation4], 0 }
   0x4   :  { %15 = vsyncpa [#allocation6], 0  ;;  %s857_s26 = smov [#allocation5]   ;;  %s787_s30 = scalar_lea.hbm %s965_s1, 4096 }
   0x5   :  { %s33_s27 = sshll.u32 %s857_s26, 4  ;;  %p788_p0 = scmp.ne.s32.totalorder %s965_s1, %s787_s30  ;;  %s34_s27 = int_to_ptr.vmem [resolvable:$true] %s33_s27 }
   0x6   :  { %p791_p1 = scmp.lt.u32.totalorder %s787_s30, %s965_s1 }
   0x8   :  { %p793_p2 = pnand %p791_p1, %p788_p0 }
   0xa   :  { %796 = shalt.err (!%p793_p2)
}
   0xb   :  { %s797_s6 = scalar_lea.vmem %s34_s27, 4096  ;;  %p802_p4 = scmp.lt.s32.totalorder %s34_s27, %s34_s27 }
   0xc   :  { %p798_p3 = scmp.ne.s32.totalorder %s34_s27, %s797_s6  ;;  %p803_p5 = scmp.lt.s32.totalorder %s797_s6, %s797_s6 }
   0xe   :  { %p804_p6 = por %p803_p5, %p802_p4 }
  0x10   :  { %p805_p7 = pnand %p804_p6, %p798_p3 }
  0x12   :  { %808 = shalt.err (!%p805_p7)
}
  0x13   :  { %s858_s12 = smov 128   ;;  %s859_s13 = smov 8  }
  0x14   :  { %39 = dma.hbm_to_vmem [thread:$0]  %s965_s1, 4096, %s34_s27, [#allocation6], %s858_s12, %s858_s12, %s859_s13  }
  0x15   :  { %s860_s16 = smov [#allocation3]   ;;  %s809_s20 = scalar_lea.hbm %s964_s0, 512 }
  0x16   :  { %s21_s17 = sshll.u32 %s860_s16, 4  ;;  %p810_p8 = scmp.ne.s32.totalorder %s964_s0, %s809_s20  ;;  %s22_s17 = int_to_ptr.vmem [resolvable:$true] %s21_s17 }
  0x17   :  { %p813_p9 = scmp.lt.u32.totalorder %s809_s20, %s964_s0 }
  0x19   :  { %p815_p10 = pnand %p813_p9, %p810_p8 }
  0x1b   :  { %818 = shalt.err (!%p815_p10)
}
  0x1c   :  { %s819_s25 = scalar_lea.vmem %s22_s17, 512  ;;  %p824_p12 = scmp.lt.s32.totalorder %s22_s17, %s22_s17 }
  0x1d   :  { %p820_p11 = scmp.ne.s32.totalorder %s22_s17, %s819_s25  ;;  %p825_p13 = scmp.lt.s32.totalorder %s819_s25, %s819_s25 }
  0x1f   :  { %p826_p0 = por %p825_p13, %p824_p12 }
  0x21   :  { %p827_p1 = pnand %p826_p0, %p820_p11 }
  0x23   :  { %830 = shalt.err (!%p827_p1)
}
  0x24   :  { %s861_s1 = smov 256   ;;  %s862_s26 = smov 16  }
  0x25   :  { %27 = dma.hbm_to_vmem [thread:$0]  %s964_s0, 512, %s22_s17, [#allocation4], %s861_s1, %s861_s1, %s862_s26  }
  0x26   :  { %s863_s29 = smov [#allocation7]   ;;  %s831_s10 = scalar_lea.hbm %s967_s3, 4096 }
  0x27   :  { %s47_s30 = sshll.u32 %s863_s29, 4  ;;  %p832_p2 = scmp.ne.s32.totalorder %s967_s3, %s831_s10  ;;  %s48_s30 = int_to_ptr.vmem [resolvable:$true] %s47_s30 }
  0x28   :  { %p835_p3 = scmp.lt.u32.totalorder %s831_s10, %s967_s3 }
  0x2a   :  { %p837_p4 = pnand %p835_p3, %p832_p2 }
  0x2c   :  { %840 = shalt.err (!%p837_p4)
}
  0x2d   :  { %s841_s16 = scalar_lea.vmem %s48_s30, 4096  ;;  %p846_p6 = scmp.lt.s32.totalorder %s48_s30, %s48_s30 }
  0x2e   :  { %p842_p5 = scmp.ne.s32.totalorder %s48_s30, %s841_s16  ;;  %p847_p7 = scmp.lt.s32.totalorder %s841_s16, %s841_s16 }
  0x30   :  { %p848_p8 = por %p847_p7, %p846_p6 }
  0x32   :  { %p849_p9 = pnand %p848_p8, %p842_p5 }
  0x34   :  { %852 = shalt.err (!%p849_p9)
}
  0x35   :  { %53 = dma.hbm_to_vmem [thread:$0]  %s967_s3, 4096, %s48_s30, [#allocation6], %s858_s12, %s858_s12, %s859_s13  }
  0x36   :  { %853 = dma.done.wait [#allocation4], 512  }
  0x37   :  { %854 = vsyncadd [#allocation4], 4294966784 }
  0x38   :  { %855 = dma.done.wait [#allocation6], 8192  }
  0x39   :  { %856 = vsyncadd [#allocation6], 4294959104  ;;  %v691_v1 = vld [vmem:[#allocation5 + $0x4] ss:$8 sps:$4 sm:$0xff]   ;;  %v693_v2 = vld [vmem:[#allocation5] ss:$8 sps:$4 sm:$0xff]  }
  0x3a   :  { %279 = vmatprep.subr.bf16.mxu0 %v691_v1  ;;  %v694_v3 = vld [vmem:[#allocation5 + $0x14] ss:$8 sps:$4 sm:$0xff]   ;;  %v696_v4 = vld [vmem:[#allocation5 + $0x10] ss:$8 sps:$4 sm:$0xff]   ;;  %v697_v5 = vld [vmem:[#allocation5 + $0x24] ss:$8 sps:$4 sm:$0xff]  }
  0x3b   :  { %280 = vmatpush1.bf16.msra.mxu0 %v693_v2  ;;  %v699_v6 = vld [vmem:[#allocation5 + $0x20] ss:$8 sps:$4 sm:$0xff]   ;;  %v700_v7 = vld [vmem:[#allocation5 + $0x34] ss:$8 sps:$4 sm:$0xff]   ;;  %v702_v8 = vld [vmem:[#allocation5 + $0x30] ss:$8 sps:$4 sm:$0xff]  }
  0x3c   :  { %281 = vmatprep.subr.bf16.mxu0 %v694_v3  ;;  %v703_v9 = vld [vmem:[#allocation5 + $0x44] ss:$8 sps:$4 sm:$0xff]   ;;  %v705_v10 = vld [vmem:[#allocation5 + $0x40] ss:$8 sps:$4 sm:$0xff]   ;;  %v706_v11 = vld [vmem:[#allocation5 + $0x54] ss:$8 sps:$4 sm:$0xff]  }
  0x3d   :  { %v708_v12 = vld [vmem:[#allocation5 + $0x50] ss:$8 sps:$4 sm:$0xff]   ;;  %v709_v13 = vld [vmem:[#allocation5 + $0x64] ss:$8 sps:$4 sm:$0xff]   ;;  %v711_v16 = vld [vmem:[#allocation5 + $0x60] ss:$8 sps:$4 sm:$0xff]  }
  0x3e   :  { %v70_v14 = vld [vmem:[#allocation3 + $0x8] sm:$0xff]  ;;  %v72_v15 = vld [vmem:[#allocation3 + $0x18] sm:$0xff]  ;;  %v69_v56 = vld [vmem:[#allocation3] sm:$0xff]  ;;  %vm610_vm0 = vcmask 7168  }
  0x3f   :  { %282 = vmatpush1.bf16.msra.mxu0 %v696_v4  ;;  %v712_v17 = vld [vmem:[#allocation5 + $0x74] ss:$8 sps:$4 sm:$0xff]   ;;  %v74_v18 = vpack.c.bf16 %v72_v15, %v70_v14  ;;  %v739_v19 = vld [vmem:[#allocation7 + $0x4] ss:$8 sps:$4 sm:$0xff]   ;;  %v741_v20 = vld [vmem:[#allocation7] ss:$8 sps:$4 sm:$0xff]  }
  0x40   :  { %283 = vmatprep.subr.bf16.mxu0 %v697_v5  ;;  %v742_v21 = vld [vmem:[#allocation7 + $0x14] ss:$8 sps:$4 sm:$0xff]   ;;  %532 = vmatprep.subr.bf16.mxu1 %v739_v19  ;;  %v744_v22 = vld [vmem:[#allocation7 + $0x10] ss:$8 sps:$4 sm:$0xff]   ;;  %v745_v24 = vld [vmem:[#allocation7 + $0x24] ss:$8 sps:$4 sm:$0xff]  }
  0x41   :  { %311 = vmatprep.mubr.bf16.mxu0 %v74_v18  ;;  %533 = vmatpush1.bf16.msra.mxu1 %v741_v20  ;;  %v714_v23 = vld [vmem:[#allocation5 + $0x70] ss:$8 sps:$4 sm:$0xff]   ;;  %v715_v25 = vld [vmem:[#allocation5 + $0x84] ss:$8 sps:$4 sm:$0xff]   ;;  %v747_v26 = vld [vmem:[#allocation7 + $0x20] ss:$8 sps:$4 sm:$0xff]  }
  0x42   :  { %534 = vmatprep.subr.bf16.mxu1 %v742_v21  ;;  %v717_v27 = vld [vmem:[#allocation5 + $0x80] ss:$8 sps:$4 sm:$0xff]   ;;  %v748_v28 = vld [vmem:[#allocation7 + $0x34] ss:$8 sps:$4 sm:$0xff]   ;;  %v750_v30 = vld [vmem:[#allocation7 + $0x30] ss:$8 sps:$4 sm:$0xff]  }
  0x43   :  { %284 = vmatpush1.bf16.msra.mxu0 %v699_v6  ;;  %v718_v29 = vld [vmem:[#allocation5 + $0x94] ss:$8 sps:$4 sm:$0xff]   ;;  %v720_v31 = vld [vmem:[#allocation5 + $0x90] ss:$8 sps:$4 sm:$0xff]   ;;  %v751_v32 = vld [vmem:[#allocation7 + $0x44] ss:$8 sps:$4 sm:$0xff]  }
  0x44   :  { %285 = vmatprep.subr.bf16.mxu0 %v700_v7  ;;  %v721_v33 = vld [vmem:[#allocation5 + $0xa4] ss:$8 sps:$4 sm:$0xff]   ;;  %v753_v34 = vld [vmem:[#allocation7 + $0x40] ss:$8 sps:$4 sm:$0xff]   ;;  %v754_v36 = vld [vmem:[#allocation7 + $0x54] ss:$8 sps:$4 sm:$0xff]   ;;  %v109_v7 = vlaneseq }
  0x45   :  { %535 = vmatpush1.bf16.msra.mxu1 %v744_v22  ;;  %v723_v35 = vld [vmem:[#allocation5 + $0xa0] ss:$8 sps:$4 sm:$0xff]   ;;  %v724_v37 = vld [vmem:[#allocation5 + $0xb4] ss:$8 sps:$4 sm:$0xff]   ;;  %v756_v38 = vld [vmem:[#allocation7 + $0x50] ss:$8 sps:$4 sm:$0xff]  }
  0x46   :  { %536 = vmatprep.subr.bf16.mxu1 %v745_v24  ;;  %v726_v39 = vld [vmem:[#allocation5 + $0xb0] ss:$8 sps:$4 sm:$0xff]   ;;  %v757_v40 = vld [vmem:[#allocation7 + $0x64] ss:$8 sps:$4 sm:$0xff]   ;;  %v759_v42 = vld [vmem:[#allocation7 + $0x60] ss:$8 sps:$4 sm:$0xff]  }
  0x47   :  { %286 = vmatpush1.bf16.msra.mxu0 %v702_v8  ;;  %v727_v41 = vld [vmem:[#allocation5 + $0xc4] ss:$8 sps:$4 sm:$0xff]   ;;  %v729_v43 = vld [vmem:[#allocation5 + $0xc0] ss:$8 sps:$4 sm:$0xff]   ;;  %v760_v44 = vld [vmem:[#allocation7 + $0x74] ss:$8 sps:$4 sm:$0xff]  }
  0x48   :  { %287 = vmatprep.subr.bf16.mxu0 %v703_v9  ;;  %v730_v45 = vld [vmem:[#allocation5 + $0xd4] ss:$8 sps:$4 sm:$0xff]   ;;  %v762_v46 = vld [vmem:[#allocation7 + $0x70] ss:$8 sps:$4 sm:$0xff]   ;;  %v763_v48 = vld [vmem:[#allocation7 + $0x84] ss:$8 sps:$4 sm:$0xff]  }
  0x49   :  { %537 = vmatpush1.bf16.msra.mxu1 %v747_v26  ;;  %v732_v47 = vld [vmem:[#allocation5 + $0xd0] ss:$8 sps:$4 sm:$0xff]   ;;  %v733_v49 = vld [vmem:[#allocation5 + $0xe4] ss:$8 sps:$4 sm:$0xff]   ;;  %v765_v50 = vld [vmem:[#allocation7 + $0x80] ss:$8 sps:$4 sm:$0xff]  }
  0x4a   :  { %538 = vmatprep.subr.bf16.mxu1 %v748_v28  ;;  %v735_v51 = vld [vmem:[#allocation5 + $0xe0] ss:$8 sps:$4 sm:$0xff]   ;;  %v766_v52 = vld [vmem:[#allocation7 + $0x94] ss:$8 sps:$4 sm:$0xff]   ;;  %v738_v54 = vld [vmem:[#allocation5 + $0xf0] ss:$8 sps:$4 sm:$0xff]  }
  0x4b   :  { %288 = vmatpush1.bf16.msra.mxu0 %v705_v10  ;;  %v736_v53 = vld [vmem:[#allocation5 + $0xf4] ss:$8 sps:$4 sm:$0xff]   ;;  %v768_v55 = vld [vmem:[#allocation7 + $0x90] ss:$8 sps:$4 sm:$0xff]   ;;  %v769_v58 = vld [vmem:[#allocation7 + $0xa4] ss:$8 sps:$4 sm:$0xff]  }
  0x4c   :  { %289 = vmatprep.subr.bf16.mxu0 %v706_v11  ;;  %v71_v57 = vld [vmem:[#allocation3 + $0x10] sm:$0xff]  ;;  %v771_v60 = vld [vmem:[#allocation7 + $0xa0] ss:$8 sps:$4 sm:$0xff]   ;;  %v775_v63 = vld [vmem:[#allocation7 + $0xc4] ss:$8 sps:$4 sm:$0xff]   ;;  %v110_v8 = vshrl.u32 %v109_v7, 7 }
  0x4d   :  { %539 = vmatpush1.bf16.msra.mxu1 %v750_v30  ;;  %v73_v59 = vpack.c.bf16 %v71_v57, %v69_v56  ;;  %v772_v61 = vld [vmem:[#allocation7 + $0xb4] ss:$8 sps:$4 sm:$0xff]   ;;  %v774_v62 = vld [vmem:[#allocation7 + $0xb0] ss:$8 sps:$4 sm:$0xff]   ;;  %v777_v0 = vld [vmem:[#allocation7 + $0xc0] ss:$8 sps:$4 sm:$0xff]  }
  0x4e   :  { %540 = vmatprep.subr.bf16.mxu1 %v751_v32  ;;  %v778_v1 = vld [vmem:[#allocation7 + $0xd4] ss:$8 sps:$4 sm:$0xff]   ;;  %v780_v2 = vld [vmem:[#allocation7 + $0xd0] ss:$8 sps:$4 sm:$0xff]   ;;  %v781_v3 = vld [vmem:[#allocation7 + $0xe4] ss:$8 sps:$4 sm:$0xff]  }
  0x4f   :  { %290 = vmatpush1.bf16.msra.mxu0 %v708_v12  ;;  %v783_v4 = vld [vmem:[#allocation7 + $0xe0] ss:$8 sps:$4 sm:$0xff]   ;;  %v784_v5 = vld [vmem:[#allocation7 + $0xf4] ss:$8 sps:$4 sm:$0xff]   ;;  %v786_v6 = vld [vmem:[#allocation7 + $0xf0] ss:$8 sps:$4 sm:$0xff]  }
  0x50   :  { %291 = vmatprep.subr.bf16.mxu0 %v709_v13  ;;  %v111_v9 = vsub.s32 0, %v110_v8  ;;  %v107_v10 = vld [vmem:[%s966_s2] sm:$0x3]  ;;  %v115_v11 = vsub.s32 1, %v110_v8 }
  0x51   :  { %541 = vmatpush1.bf16.msra.mxu1 %v753_v34  ;;  %v360_v28 = vld [vmem:[%s968_s4] sm:$0x3] }
  0x52   :  { %542 = vmatprep.subr.bf16.mxu1 %v754_v36  ;;  %v112_v12 = vrot.slane %v107_v10, %v111_v9  ;;  %v116_v13 = vrot.slane %v107_v10, %v115_v11  ;;  %v369_v30 = vrot.slane %v360_v28, %v115_v11 }
  0x53   :  { %292 = vmatpush1.bf16.msra.mxu0 %v711_v16 }
  0x54   :  { %293 = vmatprep.subr.bf16.mxu0 %v712_v17 }
  0x55   :  { %543 = vmatpush1.bf16.msra.mxu1 %v756_v38 }
  0x56   :  { %544 = vmatprep.subr.bf16.mxu1 %v757_v40 }
  0x57   :  { %294 = vmatpush1.bf16.msra.mxu0 %v714_v23 }
  0x58   :  { %295 = vmatprep.subr.bf16.mxu0 %v715_v25 }
  0x59   :  { %545 = vmatpush1.bf16.msra.mxu1 %v759_v42 }
  0x5a   :  { %546 = vmatprep.subr.bf16.mxu1 %v760_v44 }
  0x5b   :  { %296 = vmatpush1.bf16.msra.mxu0 %v717_v27 }
  0x5c   :  { %297 = vmatprep.subr.bf16.mxu0 %v718_v29  ;;  %v365_v29 = vrot.slane %v360_v28, %v111_v9 }
  0x5d   :  { %547 = vmatpush1.bf16.msra.mxu1 %v762_v46 }
  0x5e   :  { %548 = vmatprep.subr.bf16.mxu1 %v763_v48 }
  0x5f   :  { %298 = vmatpush1.bf16.msra.mxu0 %v720_v31  ;;  %v579_v31 = vld [vmem:[%s969_s5] sm:$0x3] }
  0x60   :  { %299 = vmatprep.subr.bf16.mxu0 %v721_v33  ;;  %v588_v38 = vrot.slane %v579_v31, %v115_v11 }
  0x61   :  { %549 = vmatpush1.bf16.msra.mxu1 %v765_v50 }
  0x62   :  { %550 = vmatprep.subr.bf16.mxu1 %v766_v52  ;;  %v683_v52 = vld [vmem:[#allocation2] ss:$0 sm:$0xff] }
  0x63   :  { %300 = vmatpush1.bf16.msra.mxu0 %v723_v35  ;;  %v584_v35 = vrot.slane %v579_v31, %v111_v9 }
  0x64   :  { %301 = vmatprep.subr.bf16.mxu0 %v724_v37 }
  0x65   :  { %551 = vmatpush1.bf16.msra.mxu1 %v768_v55 }
  0x66   :  { %552 = vmatprep.subr.bf16.mxu1 %v769_v58 }
  0x67   :  { %302 = vmatpush1.bf16.msra.mxu0 %v726_v39 }
  0x68   :  { %303 = vmatprep.subr.bf16.mxu0 %v727_v41 }
  0x69   :  { %553 = vmatpush1.bf16.msra.mxu1 %v771_v60 }
  0x6a   :  { %554 = vmatprep.subr.bf16.mxu1 %v772_v61 }
  0x6b   :  { %304 = vmatpush1.bf16.msra.mxu0 %v729_v43 }
  0x6c   :  { %305 = vmatprep.subr.bf16.mxu0 %v730_v45 }
  0x6d   :  { %555 = vmatpush1.bf16.msra.mxu1 %v774_v62 }
  0x6e   :  { %556 = vmatprep.subr.bf16.mxu1 %v775_v63 }
  0x6f   :  { %306 = vmatpush1.bf16.msra.mxu0 %v732_v47 }
  0x70   :  { %307 = vmatprep.subr.bf16.mxu0 %v733_v49 }
  0x71   :  { %557 = vmatpush1.bf16.msra.mxu1 %v777_v0 }
  0x72   :  { %558 = vmatprep.subr.bf16.mxu1 %v778_v1 }
  0x73   :  { %308 = vmatpush1.bf16.msra.mxu0 %v735_v51 }
  0x74   :  { %309 = vmatprep.subr.bf16.mxu0 %v736_v53 }
  0x75   :  { %559 = vmatpush1.bf16.msra.mxu1 %v780_v2 }
  0x76   :  { %560 = vmatprep.subr.bf16.mxu1 %v781_v3 }
  0x77   :  { %310 = vmatpush1.bf16.msra.mxu0 %v738_v54 }
  0x79   :  { %561 = vmatpush1.bf16.msra.mxu1 %v783_v4 }
  0x7a   :  { %312 = vmatmul.mubr.bf16.vlgmr.msra.gmra.mrb[0].mxu0 %v73_v59  ;;  %562 = vmatprep.subr.bf16.mxu1 %v784_v5 }
  0x7d   :  { %563 = vmatpush1.bf16.msra.mxu1 %v786_v6 }
 0x14d   :  { %v313_v14 = vpop.f32.mrb[0].mxu0 }
 0x14e   :  { %v314_v15 = vadd.f32 %v313_v14, %v112_v12  ;;  %v315_v16 = vpop.f32.mrb[1].mxu0 }
 0x14f   :  { %v316_v17 = vadd.f32 %v315_v16, %v116_v13  ;;  %v317_v18 = vpop.f32.mrb[2].mxu0 }
 0x150   :  { %v318_v19 = vadd.f32 %v317_v18, %v112_v12  ;;  %v319_v20 = vpop.f32.mrb[3].mxu0  ;;  %v322_v22 = vmax.f32 %v314_v15, 0.0 }
 0x151   :  { %v320_v21 = vadd.f32 %v319_v20, %v116_v13  ;;  %v323_v24 = vmax.f32 %v316_v17, 0.0 }
 0x152   :  { %v324_v23 = vmax.f32 %v318_v19, 0.0 }
 0x153   :  { %v325_v25 = vmax.f32 %v320_v21, 0.0 }
 0x154   :  { %v326_v26 = vpack.c.bf16 %v324_v23, %v322_v22 }
 0x155   :  { %v327_v27 = vpack.c.bf16 %v325_v25, %v323_v24 }
 0x157   :  { %564 = vmatprep.mubr.bf16.mxu1 %v327_v27 }
 0x158   :  { %565 = vmatmul.mubr.bf16.vlgmr.msra.gmra.mrb[0].mxu1 %v326_v26 }
 0x22b   :  { %v566_v32 = vpop.f32.mrb[0].mxu1 }
 0x22c   :  { %v567_v33 = vadd.f32 %v566_v32, %v365_v29  ;;  %v568_v34 = vpop.f32.mrb[1].mxu1 }
 0x22d   :  { %v569_v36 = vadd.f32 %v568_v34, %v369_v30  ;;  %v570_v37 = vpop.f32.mrb[2].mxu1 }
 0x22e   :  { %v575_v39 = vmax.f32 %v567_v33, 0.0  ;;  %v571_v40 = vadd.f32 %v570_v37, %v365_v29  ;;  %v572_v41 = vpop.f32.mrb[3].mxu1 }
 0x22f   :  { %v576_v42 = vmax.f32 %v569_v36, 0.0  ;;  %v573_v43 = vadd.f32 %v572_v41, %v369_v30 }
 0x230   :  { %v577_v44 = vmax.f32 %v571_v40, 0.0  ;;  %v591_v45 = vmul.f32 %v584_v35, %v575_v39 }
 0x231   :  { %v578_v46 = vmax.f32 %v573_v43, 0.0  ;;  %v592_v47 = vmul.f32 %v588_v38, %v576_v42 }
 0x232   :  { %v593_v48 = vmul.f32 %v584_v35, %v577_v44 }
 0x233   :  { %v594_v49 = vmul.f32 %v588_v38, %v578_v46  ;;  %v595_v50 = vadd.f32 %v592_v47, %v591_v45 }
 0x235   :  { %596 = vadd.xlane.f32.xlu0 %v595_v50  ;;  %v598_v51 = vadd.f32 %v594_v49, %v593_v48 }
 0x239   :  { %599 = vadd.xlane.f32.xlu0 %v598_v51 }
 0x2c2   :  { %v597_v53 = vpop.xlane.xlu0 %596 }
 0x2c3   :  { %v608_v54 = vadd.f32 %v683_v52, %v597_v53 }
 0x2c5   :  { %611 = vst.msk [vmem:[%s971_s7] sm:$0xff] %vm610_vm0, %v608_v54 }
 0x2c6   :  { %v600_v55 = vpop.xlane.xlu0 %599 }
 0x2c7   :  { %v609_v56 = vadd.f32 %v683_v52, %v600_v55 }
 0x2c9   :  { %612 = vst.msk [vmem:[%s971_s7 + $0x8] sm:$0xff] %vm610_vm0, %v609_v56 }
 0x2ca   :  { %617 = vsyncpa [#allocation4], 1 }
 0x2cb   :  { %618 = vsyncpa [#allocation6], 1 }

// kernel: tpu_custom_call.1
= control target key start
LH: loop header
LB: loop body
LE: loop exit
PB: predicated region body
PF: predicated region fallthrough
CT: control target
= control target key end

     0   :  { %s964_s0 = inlined_call_operand.hbm [shape: f32[16,256], index: 0, kind: input, shape index: {}]   ;;  %s965_s1 = inlined_call_operand.hbm [shape: bf16[256,256], index: 1, kind: input, shape index: {}]   ;;  %s966_s2 = inlined_call_operand.vmem [shape: f32[1,256], index: 2, kind: input, shape index: {}]   ;;  %s967_s3 = inlined_call_operand.hbm [shape: bf16[256,256], index: 3, kind: input, shape index: {}]   ;;  %s968_s4 = inlined_call_operand.vmem [shape: f32[1,256], index: 4, kind: input, shape index: {}]   ;;  %s969_s5 = inlined_call_operand.vmem [shape: f32[1,256], index: 5, kind: input, shape index: {}]   ;;  %s970_s6 = inlined_call_operand.<no memory space> [shape: f32[1,1], index: 6, kind: input, shape index: {}]   ;;  %s971_s7 = inlined_call_operand.vmem [shape: f32[16,1], index: 7, kind: output, shape index: {}]  }
   0x1   :  { %v12_v0 = vstv %s970_s6 }
   0x2   :  { %13 = vst [vmem:[#allocation2] sm:$0x1] %v12_v0 }
   0x3   :  { %14 = vsyncpa [#allocation4], 0 }
   0x4   :  { %15 = vsyncpa [#allocation6], 0  ;;  %s857_s26 = smov [#allocation5]   ;;  %s787_s30 = scalar_lea.hbm %s965_s1, 4096 }
   0x5   :  { %s33_s27 = sshll.u32 %s857_s26, 4  ;;  %p788_p0 = scmp.ne.s32.totalorder %s965_s1, %s787_s30  ;;  %s34_s27 = int_to_ptr.vmem [resolvable:$true] %s33_s27 }
   0x6   :  { %p791_p1 = scmp.lt.u32.totalorder %s787_s30, %s965_s1 }
   0x8   :  { %p793_p2 = pnand %p791_p1, %p788_p0 }
   0xa   :  { %796 = shalt.err (!%p793_p2)
}
   0xb   :  { %s797_s6 = scalar_lea.vmem %s34_s27, 4096  ;;  %p802_p4 = scmp.lt.s32.totalorder %s34_s27, %s34_s27 }
   0xc   :  { %p798_p3 = scmp.ne.s32.totalorder %s34_s27, %s797_s6  ;;  %p803_p5 = scmp.lt.s32.totalorder %s797_s6, %s797_s6 }
   0xe   :  { %p804_p6 = por %p803_p5, %p802_p4 }
  0x10   :  { %p805_p7 = pnand %p804_p6, %p798_p3 }
  0x12   :  { %808 = shalt.err (!%p805_p7)
}
  0x13   :  { %s858_s12 = smov 128   ;;  %s859_s13 = smov 8  }
  0x14   :  { %39 = dma.hbm_to_vmem [thread:$0]  %s965_s1, 4096, %s34_s27, [#allocation6], %s858_s12, %s858_s12, %s859_s13  }
  0x15   :  { %s860_s16 = smov [#allocation3]   ;;  %s809_s20 = scalar_lea.hbm %s964_s0, 512 }
  0x16   :  { %s21_s17 = sshll.u32 %s860_s16, 4  ;;  %p810_p8 = scmp.ne.s32.totalorder %s964_s0, %s809_s20  ;;  %s22_s17 = int_to_ptr.vmem [resolvable:$true] %s21_s17 }
  0x17   :  { %p813_p9 = scmp.lt.u32.totalorder %s809_s20, %s964_s0 }
  0x19   :  { %p815_p10 = pnand %p813_p9, %p810_p8 }
  0x1b   :  { %818 = shalt.err (!%p815_p10)
}
  0x1c   :  { %s819_s25 = scalar_lea.vmem %s22_s17, 512  ;;  %p824_p12 = scmp.lt.s32.totalorder %s22_s17, %s22_s17 }
  0x1d   :  { %p820_p11 = scmp.ne.s32.totalorder %s22_s17, %s819_s25  ;;  %p825_p13 = scmp.lt.s32.totalorder %s819_s25, %s819_s25 }
  0x1f   :  { %p826_p0 = por %p825_p13, %p824_p12 }
  0x21   :  { %p827_p1 = pnand %p826_p0, %p820_p11 }
  0x23   :  { %830 = shalt.err (!%p827_p1)
}
  0x24   :  { %s861_s1 = smov 256   ;;  %s862_s26 = smov 16  }
  0x25   :  { %27 = dma.hbm_to_vmem [thread:$0]  %s964_s0, 512, %s22_s17, [#allocation4], %s861_s1, %s861_s1, %s862_s26  }
  0x26   :  { %s863_s29 = smov [#allocation7]   ;;  %s831_s10 = scalar_lea.hbm %s967_s3, 4096 }
  0x27   :  { %s47_s30 = sshll.u32 %s863_s29, 4  ;;  %p832_p2 = scmp.ne.s32.totalorder %s967_s3, %s831_s10  ;;  %s48_s30 = int_to_ptr.vmem [resolvable:$true] %s47_s30 }
  0x28   :  { %p835_p3 = scmp.lt.u32.totalorder %s831_s10, %s967_s3 }
  0x2a   :  { %p837_p4 = pnand %p835_p3, %p832_p2 }
  0x2c   :  { %840 = shalt.err (!%p837_p4)
}
  0x2d   :  { %s841_s16 = scalar_lea.vmem %s48_s30, 4096  ;;  %p846_p6 = scmp.lt.s32.totalorder %s48_s30, %s48_s30 }
  0x2e   :  { %p842_p5 = scmp.ne.s32.totalorder %s48_s30, %s841_s16  ;;  %p847_p7 = scmp.lt.s32.totalorder %s841_s16, %s841_s16 }
  0x30   :  { %p848_p8 = por %p847_p7, %p846_p6 }
  0x32   :  { %p849_p9 = pnand %p848_p8, %p842_p5 }
  0x34   :  { %852 = shalt.err (!%p849_p9)
}
  0x35   :  { %53 = dma.hbm_to_vmem [thread:$0]  %s967_s3, 4096, %s48_s30, [#allocation6], %s858_s12, %s858_s12, %s859_s13  }
  0x36   :  { %853 = dma.done.wait [#allocation4], 512  }
  0x37   :  { %854 = vsyncadd [#allocation4], 4294966784 }
  0x38   :  { %855 = dma.done.wait [#allocation6], 8192  }
  0x39   :  { %856 = vsyncadd [#allocation6], 4294959104  ;;  %v691_v1 = vld [vmem:[#allocation5 + $0x4] ss:$8 sps:$4 sm:$0xff]   ;;  %v693_v2 = vld [vmem:[#allocation5] ss:$8 sps:$4 sm:$0xff]  }
  0x3a   :  { %279 = vmatprep.subr.bf16.mxu0 %v691_v1  ;;  %v694_v3 = vld [vmem:[#allocation5 + $0x14] ss:$8 sps:$4 sm:$0xff]   ;;  %v696_v4 = vld [vmem:[#allocation5 + $0x10] ss:$8 sps:$4 sm:$0xff]   ;;  %v697_v5 = vld [vmem:[#allocation5 + $0x24] ss:$8 sps:$4 sm:$0xff]  }
  0x3b   :  { %280 = vmatpush1.bf16.msra.mxu0 %v693_v2  ;;  %v699_v6 = vld [vmem:[#allocation5 + $0x20] ss:$8 sps:$4 sm:$0xff]   ;;  %v700_v7 = vld [vmem:[#allocation5 + $0x34] ss:$8 sps:$4 sm:$0xff]   ;;  %v702_v8 = vld [vmem:[#allocation5 + $0x30] ss:$8 sps:$4 sm:$0xff]  }
  0x3c   :  { %281 = vmatprep.subr.bf16.mxu0 %v694_v3  ;;  %v703_v9 = vld [vmem:[#allocation5 + $0x44] ss:$8 sps:$4 sm:$0xff]   ;;  %v705_v10 = vld [vmem:[#allocation5 + $0x40] ss:$8 sps:$4 sm:$0xff]   ;;  %v706_v11 = vld [vmem:[#allocation5 + $0x54] ss:$8 sps:$4 sm:$0xff]  }
  0x3d   :  { %v708_v12 = vld [vmem:[#allocation5 + $0x50] ss:$8 sps:$4 sm:$0xff]   ;;  %v709_v13 = vld [vmem:[#allocation5 + $0x64] ss:$8 sps:$4 sm:$0xff]   ;;  %v711_v16 = vld [vmem:[#allocation5 + $0x60] ss:$8 sps:$4 sm:$0xff]  }
  0x3e   :  { %v70_v14 = vld [vmem:[#allocation3 + $0x8] sm:$0xff]  ;;  %v72_v15 = vld [vmem:[#allocation3 + $0x18] sm:$0xff]  ;;  %v69_v56 = vld [vmem:[#allocation3] sm:$0xff]  ;;  %vm610_vm0 = vcmask 7168  }
  0x3f   :  { %282 = vmatpush1.bf16.msra.mxu0 %v696_v4  ;;  %v712_v17 = vld [vmem:[#allocation5 + $0x74] ss:$8 sps:$4 sm:$0xff]   ;;  %v74_v18 = vpack.c.bf16 %v72_v15, %v70_v14  ;;  %v739_v19 = vld [vmem:[#allocation7 + $0x4] ss:$8 sps:$4 sm:$0xff]   ;;  %v741_v20 = vld [vmem:[#allocation7] ss:$8 sps:$4 sm:$0xff]  }
  0x40   :  { %283 = vmatprep.subr.bf16.mxu0 %v697_v5  ;;  %v742_v21 = vld [vmem:[#allocation7 + $0x14] ss:$8 sps:$4 sm:$0xff]   ;;  %532 = vmatprep.subr.bf16.mxu1 %v739_v19  ;;  %v744_v22 = vld [vmem:[#allocation7 + $0x10] ss:$8 sps:$4 sm:$0xff]   ;;  %v745_v24 = vld [vmem:[#allocation7 + $0x24] ss:$8 sps:$4 sm:$0xff]  }
  0x41   :  { %311 = vmatprep.mubr.bf16.mxu0 %v74_v18  ;;  %533 = vmatpush1.bf16.msra.mxu1 %v741_v20  ;;  %v714_v23 = vld [vmem:[#allocation5 + $0x70] ss:$8 sps:$4 sm:$0xff]   ;;  %v715_v25 = vld [vmem:[#allocation5 + $0x84] ss:$8 sps:$4 sm:$0xff]   ;;  %v747_v26 = vld [vmem:[#allocation7 + $0x20] ss:$8 sps:$4 sm:$0xff]  }
  0x42   :  { %534 = vmatprep.subr.bf16.mxu1 %v742_v21  ;;  %v717_v27 = vld [vmem:[#allocation5 + $0x80] ss:$8 sps:$4 sm:$0xff]   ;;  %v748_v28 = vld [vmem:[#allocation7 + $0x34] ss:$8 sps:$4 sm:$0xff]   ;;  %v750_v30 = vld [vmem:[#allocation7 + $0x30] ss:$8 sps:$4 sm:$0xff]  }
  0x43   :  { %284 = vmatpush1.bf16.msra.mxu0 %v699_v6  ;;  %v718_v29 = vld [vmem:[#allocation5 + $0x94] ss:$8 sps:$4 sm:$0xff]   ;;  %v720_v31 = vld [vmem:[#allocation5 + $0x90] ss:$8 sps:$4 sm:$0xff]   ;;  %v751_v32 = vld [vmem:[#allocation7 + $0x44] ss:$8 sps:$4 sm:$0xff]  }
  0x44   :  { %285 = vmatprep.subr.bf16.mxu0 %v700_v7  ;;  %v721_v33 = vld [vmem:[#allocation5 + $0xa4] ss:$8 sps:$4 sm:$0xff]   ;;  %v753_v34 = vld [vmem:[#allocation7 + $0x40] ss:$8 sps:$4 sm:$0xff]   ;;  %v754_v36 = vld [vmem:[#allocation7 + $0x54] ss:$8 sps:$4 sm:$0xff]   ;;  %v109_v7 = vlaneseq }
  0x45   :  { %535 = vmatpush1.bf16.msra.mxu1 %v744_v22  ;;  %v723_v35 = vld [vmem:[#allocation5 + $0xa0] ss:$8 sps:$4 sm:$0xff]   ;;  %v724_v37 = vld [vmem:[#allocation5 + $0xb4] ss:$8 sps:$4 sm:$0xff]   ;;  %v756_v38 = vld [vmem:[#allocation7 + $0x50] ss:$8 sps:$4 sm:$0xff]  }
  0x46   :  { %536 = vmatprep.subr.bf16.mxu1 %v745_v24  ;;  %v726_v39 = vld [vmem:[#allocation5 + $0xb0] ss:$8 sps:$4 sm:$0xff]   ;;  %v757_v40 = vld [vmem:[#allocation7 + $0x64] ss:$8 sps:$4 sm:$0xff]   ;;  %v759_v42 = vld [vmem:[#allocation7 + $0x60] ss:$8 sps:$4 sm:$0xff]  }
  0x47   :  { %286 = vmatpush1.bf16.msra.mxu0 %v702_v8  ;;  %v727_v41 = vld [vmem:[#allocation5 + $0xc4] ss:$8 sps:$4 sm:$0xff]   ;;  %v729_v43 = vld [vmem:[#allocation5 + $0xc0] ss:$8 sps:$4 sm:$0xff]   ;;  %v760_v44 = vld [vmem:[#allocation7 + $0x74] ss:$8 sps:$4 sm:$0xff]  }
  0x48   :  { %287 = vmatprep.subr.bf16.mxu0 %v703_v9  ;;  %v730_v45 = vld [vmem:[#allocation5 + $0xd4] ss:$8 sps:$4 sm:$0xff]   ;;  %v762_v46 = vld [vmem:[#allocation7 + $0x70] ss:$8 sps:$4 sm:$0xff]   ;;  %v763_v48 = vld [vmem:[#allocation7 + $0x84] ss:$8 sps:$4 sm:$0xff]  }
  0x49   :  { %537 = vmatpush1.bf16.msra.mxu1 %v747_v26  ;;  %v732_v47 = vld [vmem:[#allocation5 + $0xd0] ss:$8 sps:$4 sm:$0xff]   ;;  %v733_v49 = vld [vmem:[#allocation5 + $0xe4] ss:$8 sps:$4 sm:$0xff]   ;;  %v765_v50 = vld [vmem:[#allocation7 + $0x80] ss:$8 sps:$4 sm:$0xff]  }
  0x4a   :  { %538 = vmatprep.subr.bf16.mxu1 %v748_v28  ;;  %v735_v51 = vld [vmem:[#allocation5 + $0xe0] ss:$8 sps:$4 sm:$0xff]   ;;  %v766_v52 = vld [vmem:[#allocation7 + $0x94] ss:$8 sps:$4 sm:$0xff]   ;;  %v738_v54 = vld [vmem:[#allocation5 + $0xf0] ss:$8 sps:$4 sm:$0xff]  }
  0x4b   :  { %288 = vmatpush1.bf16.msra.mxu0 %v705_v10  ;;  %v736_v53 = vld [vmem:[#allocation5 + $0xf4] ss:$8 sps:$4 sm:$0xff]   ;;  %v768_v55 = vld [vmem:[#allocation7 + $0x90] ss:$8 sps:$4 sm:$0xff]   ;;  %v769_v58 = vld [vmem:[#allocation7 + $0xa4] ss:$8 sps:$4 sm:$0xff]  }
  0x4c   :  { %289 = vmatprep.subr.bf16.mxu0 %v706_v11  ;;  %v71_v57 = vld [vmem:[#allocation3 + $0x10] sm:$0xff]  ;;  %v771_v60 = vld [vmem:[#allocation7 + $0xa0] ss:$8 sps:$4 sm:$0xff]   ;;  %v775_v63 = vld [vmem:[#allocation7 + $0xc4] ss:$8 sps:$4 sm:$0xff]   ;;  %v110_v8 = vshrl.u32 %v109_v7, 7 }
  0x4d   :  { %539 = vmatpush1.bf16.msra.mxu1 %v750_v30  ;;  %v73_v59 = vpack.c.bf16 %v71_v57, %v69_v56  ;;  %v772_v61 = vld [vmem:[#allocation7 + $0xb4] ss:$8 sps:$4 sm:$0xff]   ;;  %v774_v62 = vld [vmem:[#allocation7 + $0xb0] ss:$8 sps:$4 sm:$0xff]   ;;  %v777_v0 = vld [vmem:[#allocation7 + $0xc0] ss:$8 sps:$4 sm:$0xff]  }
  0x4e   :  { %540 = vmatprep.subr.bf16.mxu1 %v751_v32  ;;  %v778_v1 = vld [vmem:[#allocation7 + $0xd4] ss:$8 sps:$4 sm:$0xff]   ;;  %v780_v2 = vld [vmem:[#allocation7 + $0xd0] ss:$8 sps:$4 sm:$0xff]   ;;  %v781_v3 = vld [vmem:[#allocation7 + $0xe4] ss:$8 sps:$4 sm:$0xff]  }
  0x4f   :  { %290 = vmatpush1.bf16.msra.mxu0 %v708_v12  ;;  %v783_v4 = vld [vmem:[#allocation7 + $0xe0] ss:$8 sps:$4 sm:$0xff]   ;;  %v784_v5 = vld [vmem:[#allocation7 + $0xf4] ss:$8 sps:$4 sm:$0xff]   ;;  %v786_v6 = vld [vmem:[#allocation7 + $0xf0] ss:$8 sps:$4 sm:$0xff]  }
  0x50   :  { %291 = vmatprep.subr.bf16.mxu0 %v709_v13  ;;  %v111_v9 = vsub.s32 0, %v110_v8  ;;  %v107_v10 = vld [vmem:[%s966_s2] sm:$0x3]  ;;  %v115_v11 = vsub.s32 1, %v110_v8 }
  0x51   :  { %541 = vmatpush1.bf16.msra.mxu1 %v753_v34  ;;  %v360_v28 = vld [vmem:[%s968_s4] sm:$0x3] }
  0x52   :  { %542 = vmatprep.subr.bf16.mxu1 %v754_v36  ;;  %v112_v12 = vrot.slane %v107_v10, %v111_v9  ;;  %v116_v13 = vrot.slane %v107_v10, %v115_v11  ;;  %v369_v30 = vrot.slane %v360_v28, %v115_v11 }
  0x53   :  { %292 = vmatpush1.bf16.msra.mxu0 %v711_v16 }
  0x54   :  { %293 = vmatprep.subr.bf16.mxu0 %v712_v17 }
  0x55   :  { %543 = vmatpush1.bf16.msra.mxu1 %v756_v38 }
  0x56   :  { %544 = vmatprep.subr.bf16.mxu1 %v757_v40 }
  0x57   :  { %294 = vmatpush1.bf16.msra.mxu0 %v714_v23 }
  0x58   :  { %295 = vmatprep.subr.bf16.mxu0 %v715_v25 }
  0x59   :  { %545 = vmatpush1.bf16.msra.mxu1 %v759_v42 }
  0x5a   :  { %546 = vmatprep.subr.bf16.mxu1 %v760_v44 }
  0x5b   :  { %296 = vmatpush1.bf16.msra.mxu0 %v717_v27 }
  0x5c   :  { %297 = vmatprep.subr.bf16.mxu0 %v718_v29  ;;  %v365_v29 = vrot.slane %v360_v28, %v111_v9 }
  0x5d   :  { %547 = vmatpush1.bf16.msra.mxu1 %v762_v46 }
  0x5e   :  { %548 = vmatprep.subr.bf16.mxu1 %v763_v48 }
  0x5f   :  { %298 = vmatpush1.bf16.msra.mxu0 %v720_v31  ;;  %v579_v31 = vld [vmem:[%s969_s5] sm:$0x3] }
  0x60   :  { %299 = vmatprep.subr.bf16.mxu0 %v721_v33  ;;  %v588_v38 = vrot.slane %v579_v31, %v115_v11 }
  0x61   :  { %549 = vmatpush1.bf16.msra.mxu1 %v765_v50 }
  0x62   :  { %550 = vmatprep.subr.bf16.mxu1 %v766_v52  ;;  %v683_v52 = vld [vmem:[#allocation2] ss:$0 sm:$0xff] }
  0x63   :  { %300 = vmatpush1.bf16.msra.mxu0 %v723_v35  ;;  %v584_v35 = vrot.slane %v579_v31, %v111_v9 }
  0x64   :  { %301 = vmatprep.subr.bf16.mxu0 %v724_v37 }
  0x65   :  { %551 = vmatpush1.bf16.msra.mxu1 %v768_v55 }
  0x66   :  { %552 = vmatprep.subr.bf16.mxu1 %v769_v58 }
  0x67   :  { %302 = vmatpush1.bf16.msra.mxu0 %v726_v39 }
  0x68   :  { %303 = vmatprep.subr.bf16.mxu0 %v727_v41 }
  0x69   :  { %553 = vmatpush1.bf16.msra.mxu1 %v771_v60 }
  0x6a   :  { %554 = vmatprep.subr.bf16.mxu1 %v772_v61 }
  0x6b   :  { %304 = vmatpush1.bf16.msra.mxu0 %v729_v43 }
  0x6c   :  { %305 = vmatprep.subr.bf16.mxu0 %v730_v45 }
  0x6d   :  { %555 = vmatpush1.bf16.msra.mxu1 %v774_v62 }
  0x6e   :  { %556 = vmatprep.subr.bf16.mxu1 %v775_v63 }
  0x6f   :  { %306 = vmatpush1.bf16.msra.mxu0 %v732_v47 }
  0x70   :  { %307 = vmatprep.subr.bf16.mxu0 %v733_v49 }
  0x71   :  { %557 = vmatpush1.bf16.msra.mxu1 %v777_v0 }
  0x72   :  { %558 = vmatprep.subr.bf16.mxu1 %v778_v1 }
  0x73   :  { %308 = vmatpush1.bf16.msra.mxu0 %v735_v51 }
  0x74   :  { %309 = vmatprep.subr.bf16.mxu0 %v736_v53 }
  0x75   :  { %559 = vmatpush1.bf16.msra.mxu1 %v780_v2 }
  0x76   :  { %560 = vmatprep.subr.bf16.mxu1 %v781_v3 }
  0x77   :  { %310 = vmatpush1.bf16.msra.mxu0 %v738_v54 }
  0x79   :  { %561 = vmatpush1.bf16.msra.mxu1 %v783_v4 }
  0x7a   :  { %312 = vmatmul.mubr.bf16.vlgmr.msra.gmra.mrb[0].mxu0 %v73_v59  ;;  %562 = vmatprep.subr.bf16.mxu1 %v784_v5 }
  0x7d   :  { %563 = vmatpush1.bf16.msra.mxu1 %v786_v6 }
 0x14d   :  { %v313_v14 = vpop.f32.mrb[0].mxu0 }
 0x14e   :  { %v314_v15 = vadd.f32 %v313_v14, %v112_v12  ;;  %v315_v16 = vpop.f32.mrb[1].mxu0 }
 0x14f   :  { %v316_v17 = vadd.f32 %v315_v16, %v116_v13  ;;  %v317_v18 = vpop.f32.mrb[2].mxu0 }
 0x150   :  { %v318_v19 = vadd.f32 %v317_v18, %v112_v12  ;;  %v319_v20 = vpop.f32.mrb[3].mxu0  ;;  %v322_v22 = vmax.f32 %v314_v15, 0.0 }
 0x151   :  { %v320_v21 = vadd.f32 %v319_v20, %v116_v13  ;;  %v323_v24 = vmax.f32 %v316_v17, 0.0 }
 0x152   :  { %v324_v23 = vmax.f32 %v318_v19, 0.0 }
 0x153   :  { %v325_v25 = vmax.f32 %v320_v21, 0.0 }
 0x154   :  { %v326_v26 = vpack.c.bf16 %v324_v23, %v322_v22 }
 0x155   :  { %v327_v27 = vpack.c.bf16 %v325_v25, %v323_v24 }
 0x157   :  { %564 = vmatprep.mubr.bf16.mxu1 %v327_v27 }
 0x158   :  { %565 = vmatmul.mubr.bf16.vlgmr.msra.gmra.mrb[0].mxu1 %v326_v26 }
 0x22b   :  { %v566_v32 = vpop.f32.mrb[0].mxu1 }
 0x22c   :  { %v567_v33 = vadd.f32 %v566_v32, %v365_v29  ;;  %v568_v34 = vpop.f32.mrb[1].mxu1 }
 0x22d   :  { %v569_v36 = vadd.f32 %v568_v34, %v369_v30  ;;  %v570_v37 = vpop.f32.mrb[2].mxu1 }
 0x22e   :  { %v575_v39 = vmax.f32 %v567_v33, 0.0  ;;  %v571_v40 = vadd.f32 %v570_v37, %v365_v29  ;;  %v572_v41 = vpop.f32.mrb[3].mxu1 }
 0x22f   :  { %v576_v42 = vmax.f32 %v569_v36, 0.0  ;;  %v573_v43 = vadd.f32 %v572_v41, %v369_v30 }
 0x230   :  { %v577_v44 = vmax.f32 %v571_v40, 0.0  ;;  %v591_v45 = vmul.f32 %v584_v35, %v575_v39 }
 0x231   :  { %v578_v46 = vmax.f32 %v573_v43, 0.0  ;;  %v592_v47 = vmul.f32 %v588_v38, %v576_v42 }
 0x232   :  { %v593_v48 = vmul.f32 %v584_v35, %v577_v44 }
 0x233   :  { %v594_v49 = vmul.f32 %v588_v38, %v578_v46  ;;  %v595_v50 = vadd.f32 %v592_v47, %v591_v45 }
 0x235   :  { %596 = vadd.xlane.f32.xlu0 %v595_v50  ;;  %v598_v51 = vadd.f32 %v594_v49, %v593_v48 }
 0x239   :  { %599 = vadd.xlane.f32.xlu0 %v598_v51 }
 0x2c2   :  { %v597_v53 = vpop.xlane.xlu0 %596 }
 0x2c3   :  { %v608_v54 = vadd.f32 %v683_v52, %v597_v53 }
 0x2c5   :  { %611 = vst.msk [vmem:[%s971_s7] sm:$0xff] %vm610_vm0, %v608_v54 }
 0x2c6   :  { %v600_v55 = vpop.xlane.xlu0 %599 }
 0x2c7   :  { %v609_v56 = vadd.f32 %v683_v52, %v600_v55 }
 0x2c9   :  { %612 = vst.msk [vmem:[%s971_s7 + $0x8] sm:$0xff] %vm610_vm0, %v609_v56 }
 0x2ca   :  { %617 = vsyncpa [#allocation4], 1 }
 0x2cb   :  { %618 = vsyncpa [#allocation6], 1 }

</bundles_post_ra>
